<compile_context>
chip_gen: v6e
topology: v6e:2x2x1
jax: 0.10.0
libtpu: 0.0.40
codegen_flags: <defaults>
</compile_context>

<pallas_src>
import functools

import jax
import jax.numpy as jnp
from jax import lax
from jax.experimental import pallas as pl
from jax.experimental.pallas import tpu as pltpu


def _round_up(x, m):
    return (x + m - 1) // m * m


def double_linear_kernel(x_ref, w1_ref, b1_ref, w2_ref, b2_ref, o_ref, *,
                         b_real, h_real):
    # lin1: (Bp, INp) bf16 @ (INp, Hp) bf16 -> f32 accumulate, + (1, Hp) f32 bias.
    h = jnp.dot(x_ref[...], w1_ref[...], preferred_element_type=jnp.float32)
    h = h + b1_ref[...]

    # Global max over the *real* (unpadded) region only: padded rows carry the bias
    # broadcast and padded cols carry zeros; neither must influence the max.
    rows = lax.broadcasted_iota(jnp.int32, h.shape, 0)
    cols = lax.broadcasted_iota(jnp.int32, h.shape, 1)
    valid = (rows < b_real) & (cols < h_real)
    m = jnp.max(jnp.where(valid, h, -jnp.inf), axis=(0, 1), keepdims=True)  # (1, 1) f32
    inv_m = pl.reciprocal(m, approx=True)  # EUP slot; ~1e-3 relative error

    # lin2 on the unscaled h (scalar divide deferred past the matmul; algebraically
    # identical since m is a scalar). Padded hidden cols multiply zero rows of w2.
    y0 = jnp.dot(h.astype(jnp.bfloat16), w2_ref[...],
                 preferred_element_type=jnp.float32)
    o_ref[...] = (y0 * inv_m + b2_ref[...]).astype(o_ref.dtype)


def double_linear(x, w1, b1, w2, b2):
    B, in_dim = x.shape
    hidden = w1.shape[1]
    out_dim = w2.shape[1]

    # Pad to hardware-friendly shapes: last dim multiple of 128 (lanes), batch to 8 (sublanes).
    bp = _round_up(B, 8)
    inp = _round_up(in_dim, 128)
    hp = _round_up(hidden, 128)
    outp = _round_up(out_dim, 128)

    xp = jnp.pad(x, ((0, bp - B), (0, inp - in_dim))).astype(jnp.bfloat16)
    w1p = jnp.pad(w1, ((0, inp - in_dim), (0, hp - hidden))).astype(jnp.bfloat16)
    b1p = jnp.pad(b1, ((0, 0), (0, hp - hidden)))                       # stays f32
    w2p = jnp.pad(w2, ((0, hp - hidden), (0, outp - out_dim))).astype(jnp.bfloat16)
    b2p = jnp.pad(b2, ((0, 0), (0, outp - out_dim)))                    # stays f32

    vmem = pltpu.MemorySpace.VMEM
    out = pl.pallas_call(
        functools.partial(double_linear_kernel, b_real=B, h_real=hidden),
        out_shape=jax.ShapeDtypeStruct((bp, outp), jnp.float32),
        in_specs=[pl.BlockSpec(memory_space=vmem) for _ in range(5)],
        out_specs=pl.BlockSpec(memory_space=vmem),
    )(xp, w1p, b1p, w2p, b2p)
    # TODO(synk): if B / hidden grow beyond scoped VMEM, tile the batch with a grid
    # ("parallel" for v7x's 2 TCs) and turn the global max into a two-pass cross-tile
    # reduction instead of the in-kernel jnp.max.
    return out[:B, :out_dim]


def init_params(key, in_dim, out_dim, hidden_dim):
    # Deterministic init mimicking nn.Linear's uniform(-1/sqrt(fan_in), 1/sqrt(fan_in)).
    k1, k2, k3, k4 = jax.random.split(key, 4)
    bound1 = 1.0 / jnp.sqrt(in_dim)
    bound2 = 1.0 / jnp.sqrt(hidden_dim)
    w1 = jax.random.uniform(k1, (in_dim, hidden_dim), jnp.float32, -bound1, bound1)
    b1 = jax.random.uniform(k2, (1, hidden_dim), jnp.float32, -bound1, bound1)
    w2 = jax.random.uniform(k3, (hidden_dim, out_dim), jnp.float32, -bound2, bound2)
    b2 = jax.random.uniform(k4, (1, out_dim), jnp.float32, -bound2, bound2)
    return w1, b1, w2, b2


if __name__ == "__main__":
    # Small shapes consistent with DoubleLinear(in_dimensions, out_dimensions, hidden_dimension)
    B, IN_DIM, HIDDEN, OUT_DIM = 2, 16, 32, 8

    key = jax.random.PRNGKey(0)
    kx, kp = jax.random.split(key)
    x = jax.random.normal(kx, (B, IN_DIM), jnp.float32)
    w1, b1, w2, b2 = init_params(kp, IN_DIM, OUT_DIM, HIDDEN)

    out = double_linear(x, w1, b1, w2, b2)
    out = jax.block_until_ready(out)
    assert out.shape == (B, OUT_DIM)

    # Pure-JAX f32 reference (same semantics as the PyTorch forward).
    h_ref = x @ w1 + b1
    h_ref = h_ref / jnp.max(h_ref)
    y_ref = h_ref @ w2 + b2
    # Tolerance accounts for bf16 matmul operands + approximate reciprocal.
    assert jnp.allclose(out, y_ref, atol=5e-2, rtol=5e-2), "mismatch vs reference"

    print("KERNEL_OK")
</pallas_src>

<mosaic_0001>
module attributes {stable_mosaic.version = 11 : i64} {
  func.func @double_linear_kernel(%arg0: memref<8x128xbf16, #tpu.memory_space<vmem>>, %arg1: memref<128x128xbf16, #tpu.memory_space<vmem>>, %arg2: memref<1x128xf32, #tpu.memory_space<vmem>>, %arg3: memref<128x128xbf16, #tpu.memory_space<vmem>>, %arg4: memref<1x128xf32, #tpu.memory_space<vmem>>, %arg5: memref<8x128xf32, #tpu.memory_space<vmem>>) attributes {dimension_semantics = [], scalar_prefetch = 0 : i64, scratch_operands = 0 : i64, tpu.core_type = #tpu.core_type<tc>} {
    %c0 = arith.constant 0 : index
    %c0_0 = arith.constant 0 : index
    %0 = vector.load %arg0[%c0, %c0_0] : memref<8x128xbf16, #tpu.memory_space<vmem>>, vector<8x128xbf16>
    %c0_1 = arith.constant 0 : index
    %c0_2 = arith.constant 0 : index
    %1 = vector.load %arg1[%c0_1, %c0_2] : memref<128x128xbf16, #tpu.memory_space<vmem>>, vector<128x128xbf16>
    %cst = arith.constant dense<0.000000e+00> : vector<8x128xf32>
    %2 = tpu.matmul %0, %1, %cst {dimension_numbers = #tpu.dot_dimension_numbers<[1], [0], [0], [1], [0, 0, 1, 1], [], []>} : vector<8x128xbf16>, vector<128x128xbf16>, vector<8x128xf32> -> vector<8x128xf32>
    %c0_3 = arith.constant 0 : index
    %c0_4 = arith.constant 0 : index
    %3 = vector.load %arg2[%c0_3, %c0_4] : memref<1x128xf32, #tpu.memory_space<vmem>>, vector<1x128xf32>
    %4 = vector.broadcast %3 : vector<1x128xf32> to vector<8x128xf32>
    %5 = arith.addf %2, %4 : vector<8x128xf32>
    %6 = tpu.iota {dimensions = array<i32: 0>} : vector<8x128xi32>
    %7 = tpu.iota {dimensions = array<i32: 1>} : vector<8x128xi32>
    %c2_i32 = arith.constant 2 : i32
    %8 = vector.broadcast %c2_i32 : i32 to vector<8x128xi32>
    %9 = arith.cmpi slt, %6, %8 : vector<8x128xi32>
    %c32_i32 = arith.constant 32 : i32
    %10 = vector.broadcast %c32_i32 : i32 to vector<8x128xi32>
    %11 = arith.cmpi slt, %7, %10 : vector<8x128xi32>
    %12 = arith.andi %9, %11 : vector<8x128xi1>
    %cst_5 = arith.constant 0xFF800000 : f32
    %13 = vector.broadcast %cst_5 : f32 to vector<8x128xf32>
    %14 = arith.select %12, %5, %13 : vector<8x128xi1>, vector<8x128xf32>
    %15 = vector.shape_cast %14 : vector<8x128xf32> to vector<1x8x128xf32>
    %cst_6 = arith.constant dense<0xFF800000> : vector<1xf32>
    %16 = vector.multi_reduction <maximumf>, %15, %cst_6 [1, 2] : vector<1x8x128xf32> to vector<1xf32>
    %17 = vector.shape_cast %16 : vector<1xf32> to vector<1x1x1xf32>
    %18 = vector.extract %17[0, 0, 0] : f32 from vector<1x1x1xf32>
    %19 = vector.broadcast %18 : f32 to vector<1x1xf32>
    %20 = tpu.reciprocal %19 {approx = true} : vector<1x1xf32> -> vector<1x1xf32>
    %21 = arith.truncf %5 : vector<8x128xf32> to vector<8x128xbf16>
    %c0_7 = arith.constant 0 : index
    %c0_8 = arith.constant 0 : index
    %22 = vector.load %arg3[%c0_7, %c0_8] : memref<128x128xbf16, #tpu.memory_space<vmem>>, vector<128x128xbf16>
    %cst_9 = arith.constant dense<0.000000e+00> : vector<8x128xf32>
    %23 = tpu.matmul %21, %22, %cst_9 {dimension_numbers = #tpu.dot_dimension_numbers<[1], [0], [0], [1], [0, 0, 1, 1], [], []>} : vector<8x128xbf16>, vector<128x128xbf16>, vector<8x128xf32> -> vector<8x128xf32>
    %24 = vector.broadcast %20 : vector<1x1xf32> to vector<8x128xf32>
    %25 = arith.mulf %23, %24 : vector<8x128xf32>
    %c0_10 = arith.constant 0 : index
    %c0_11 = arith.constant 0 : index
    %26 = vector.load %arg4[%c0_10, %c0_11] : memref<1x128xf32, #tpu.memory_space<vmem>>, vector<1x128xf32>
    %27 = vector.broadcast %26 : vector<1x128xf32> to vector<8x128xf32>
    %28 = arith.addf %25, %27 : vector<8x128xf32>
    %c0_12 = arith.constant 0 : index
    %c0_13 = arith.constant 0 : index
    %29 = vector.load %arg5[%c0_12, %c0_13] : memref<8x128xf32, #tpu.memory_space<vmem>>, vector<8x128xf32>
    tpu.vector_store %arg5[%c0_12, %c0_13], %28 {strides = array<i32>} : memref<8x128xf32, #tpu.memory_space<vmem>>, vector<8x128xf32>,
    return
  }
}

</mosaic_0001>

<bundles_post_ra>
// kernel: tpu_custom_call.1
= control target key start
LH: loop header
LB: loop body
LE: loop exit
PB: predicated region body
PF: predicated region fallthrough
CT: control target
= control target key end

     0   :  { %10 = vsyncpa [#allocation3], 0  ;;  %s569_s0 = inlined_call_operand.hbm [shape: bf16[8,128], index: 0, kind: input, shape index: {}]   ;;  %s570_s1 = inlined_call_operand.hbm [shape: bf16[128,128], index: 1, kind: input, shape index: {}]   ;;  %s571_s2 = inlined_call_operand.vmem [shape: f32[1,128], index: 2, kind: input, shape index: {}]   ;;  %s572_s3 = inlined_call_operand.hbm [shape: bf16[128,128], index: 3, kind: input, shape index: {}]   ;;  %s573_s4 = inlined_call_operand.vmem [shape: f32[1,128], index: 4, kind: input, shape index: {}]   ;;  %s574_s5 = inlined_call_operand.hbm [shape: f32[8,128], index: 5, kind: output, shape index: {}]  }
   0x1   :  { %11 = vsyncpa [#allocation6], 0 }
   0x2   :  { %12 = vsyncpa [#allocation4], 0  ;;  %s513_s18 = smov [#allocation5]  }
   0x3   :  { %s28_s19 = sshll.u32 %s513_s18, 4  ;;  %s29_s19 = int_to_ptr.vmem [resolvable:$true] %s28_s19 }
   0x4   :  { %s435_s20 = scalar_lea.vmem %s29_s19, 1024  ;;  %p440_p1 = scmp.lt.s32.totalorder %s29_s19, %s29_s19 }
   0x5   :  { %p436_p0 = scmp.ne.s32.totalorder %s29_s19, %s435_s20  ;;  %p441_p2 = scmp.lt.s32.totalorder %s435_s20, %s435_s20 }
   0x7   :  { %p442_p3 = por %p441_p2, %p440_p1 }
   0x9   :  { %p443_p4 = pnand %p442_p3, %p436_p0 }
   0xb   :  { %446 = shalt.err (!%p443_p4)
}
   0xc   :  { %s514_s21 = smov 64   ;;  %s515_s22 = smov 4  }
   0xd   :  { %34 = dma.hbm_to_vmem [thread:$0]  %s570_s1, 1024, %s29_s19, [#allocation6], %s514_s21, %s514_s21, %s515_s22  }
   0xe   :  { %s516_s25 = smov [#allocation2]   ;;  %s517_s27 = smov [#allocation7]  }
   0xf   :  { %s19_s26 = sshll.u32 %s516_s25, 4  ;;  %s42_s28 = sshll.u32 %s517_s27, 4  ;;  %s20_s26 = int_to_ptr.vmem [resolvable:$true] %s19_s26  ;;  %s43_s28 = int_to_ptr.vmem [resolvable:$true] %s42_s28 }
  0x10   :  { %s455_s29 = scalar_lea.vmem %s20_s26, 64  ;;  %p460_p6 = scmp.lt.s32.totalorder %s20_s26, %s20_s26 }
  0x11   :  { %p456_p5 = scmp.ne.s32.totalorder %s20_s26, %s455_s29  ;;  %p461_p7 = scmp.lt.s32.totalorder %s455_s29, %s455_s29 }
  0x13   :  { %p462_p8 = por %p461_p7, %p460_p6 }
  0x15   :  { %p463_p9 = pnand %p462_p8, %p456_p5 }
  0x17   :  { %466 = shalt.err (!%p463_p9)
}
  0x18   :  { %22 = dma.hbm_to_vmem [thread:$0]  %s569_s0, 64, %s20_s26, [#allocation3]  }
  0x19   :  { %s475_s7 = scalar_lea.vmem %s43_s28, 1024  ;;  %p480_p11 = scmp.lt.s32.totalorder %s43_s28, %s43_s28 }
  0x1a   :  { %p476_p10 = scmp.ne.s32.totalorder %s43_s28, %s475_s7  ;;  %p481_p12 = scmp.lt.s32.totalorder %s475_s7, %s475_s7 }
  0x1c   :  { %p482_p13 = por %p481_p12, %p480_p11 }
  0x1e   :  { %p483_p0 = pnand %p482_p13, %p476_p10 }
  0x20   :  { %486 = shalt.err (!%p483_p0)
}
  0x21   :  { %48 = dma.hbm_to_vmem [thread:$0]  %s572_s3, 1024, %s43_s28, [#allocation6], %s514_s21, %s514_s21, %s515_s22  }
  0x22   :  { %507 = dma.done.wait [#allocation3], 64  }
  0x23   :  { %508 = vsyncadd [#allocation3], 4294967232 }
  0x24   :  { %509 = dma.done.wait [#allocation6], 2048  }
  0x25   :  { %510 = vsyncadd [#allocation6], 4294965248  ;;  %v518_v0 = vmov 0.0   ;;  %vm519_vm0 = vmmov 0   ;;  %v409_v1 = vld [vmem:[#allocation5 + $0x38] sm:$0xff]   ;;  %v410_v2 = vld [vmem:[#allocation5 + $0x30] sm:$0xff]   ;;  %v173_v18 = vlaneseq }
  0x26   :  { %359 = vmatprep.subr.bf16.mxu0 %v518_v0  ;;  %375 = vmatprep.mubr.msk.bf16.mxu0 %vm519_vm0, %v518_v0  ;;  %v411_v3 = vld [vmem:[#allocation5 + $0x28] sm:$0xff]   ;;  %v417_v4 = vld [vmem:[#allocation7 + $0x38] sm:$0xff]   ;;  %v412_v5 = vld [vmem:[#allocation5 + $0x20] sm:$0xff]   ;;  %s520_s11 = smov [#allocation8]  }
  0x27   :  { %379 = vmatprep.subr.bf16.mxu1 %v518_v0  ;;  %395 = vmatprep.mubr.msk.bf16.mxu1 %vm519_vm0, %v518_v0  ;;  %v418_v6 = vld [vmem:[#allocation7 + $0x30] sm:$0xff]   ;;  %v413_v7 = vld [vmem:[#allocation5 + $0x18] sm:$0xff]   ;;  %v419_v8 = vld [vmem:[#allocation7 + $0x28] sm:$0xff]   ;;  %v174_v19 = vshrl.u32 %v173_v18, 7  ;;  %v176_v20 = vand.u32 127, %v173_v18  ;;  %s313_s12 = sshll.u32 %s520_s11, 4  ;;  %s314_s12 = int_to_ptr.vmem [resolvable:$true] %s313_s12 }
  0x28   :  { %360 = vmatpush3.bf16.msra.mxu0 %v409_v1  ;;  %380 = vmatpush3.bf16.msra.mxu1 %v417_v4  ;;  %v414_v9 = vld [vmem:[#allocation5 + $0x10] sm:$0xff]   ;;  %v420_v10 = vld [vmem:[#allocation7 + $0x20] sm:$0xff]   ;;  %v415_v11 = vld [vmem:[#allocation5 + $0x8] sm:$0xff]   ;;  %s487_s13 = scalar_lea.vmem %s314_s12, 128  ;;  %p492_p2 = scmp.lt.s32.totalorder %s314_s12, %s314_s12 }
  0x29   :  { %361 = vmatprep.subr.bf16.mxu0 %v518_v0  ;;  %381 = vmatprep.subr.bf16.mxu1 %v518_v0  ;;  %v421_v12 = vld [vmem:[#allocation7 + $0x18] sm:$0xff]   ;;  %v416_v13 = vld [vmem:[#allocation5] sm:$0xff]   ;;  %v422_v14 = vld [vmem:[#allocation7 + $0x10] sm:$0xff]   ;;  %vm177_vm1 = vcmp.lt.s32.totalorder %v174_v19, 2  ;;  %vm178_vm2 = vcmp.lt.s32.totalorder %v176_v20, 32  ;;  %p488_p1 = scmp.ne.s32.totalorder %s314_s12, %s487_s13  ;;  %p493_p3 = scmp.lt.s32.totalorder %s487_s13, %s487_s13 }
  0x2a   :  { %v61_v15 = vld [vmem:[#allocation2] sm:$0xf]  ;;  %v423_v16 = vld [vmem:[#allocation7 + $0x8] sm:$0xff]   ;;  %v424_v17 = vld [vmem:[#allocation7] sm:$0xff]  }
  0x2b   :  { %v323_v21 = vld [vmem:[%s571_s2] ss:$0 sm:$0xff]  ;;  %vm179_vm3 = vmand %vm177_vm1, %vm178_vm2  ;;  %p494_p4 = por %p493_p3, %p492_p2 }
  0x2c   :  { %362 = vmatpush3.bf16.msra.mxu0 %v410_v2  ;;  %382 = vmatpush3.bf16.msra.mxu1 %v418_v6  ;;  %v340_v42 = vld [vmem:[%s573_s4] ss:$0 sm:$0xff] }
  0x2d   :  { %363 = vmatprep.subr.bf16.mxu0 %v518_v0  ;;  %383 = vmatprep.subr.bf16.mxu1 %v518_v0  ;;  %p495_p5 = pnand %p494_p4, %p488_p1 }
  0x30   :  { %364 = vmatpush3.bf16.msra.mxu0 %v411_v3  ;;  %384 = vmatpush3.bf16.msra.mxu1 %v419_v8 }
  0x31   :  { %365 = vmatprep.subr.bf16.mxu0 %v518_v0  ;;  %385 = vmatprep.subr.bf16.mxu1 %v518_v0 }
  0x34   :  { %366 = vmatpush3.bf16.msra.mxu0 %v412_v5  ;;  %386 = vmatpush3.bf16.msra.mxu1 %v420_v10 }
  0x35   :  { %367 = vmatprep.subr.bf16.mxu0 %v518_v0  ;;  %387 = vmatprep.subr.bf16.mxu1 %v518_v0 }
  0x38   :  { %368 = vmatpush3.bf16.msra.mxu0 %v413_v7  ;;  %388 = vmatpush3.bf16.msra.mxu1 %v421_v12 }
  0x39   :  { %369 = vmatprep.subr.bf16.mxu0 %v518_v0  ;;  %389 = vmatprep.subr.bf16.mxu1 %v518_v0 }
  0x3c   :  { %370 = vmatpush3.bf16.msra.mxu0 %v414_v9  ;;  %390 = vmatpush3.bf16.msra.mxu1 %v422_v14 }
  0x3d   :  { %371 = vmatprep.subr.bf16.mxu0 %v518_v0  ;;  %391 = vmatprep.subr.bf16.mxu1 %v518_v0 }
  0x40   :  { %372 = vmatpush3.bf16.msra.mxu0 %v415_v11  ;;  %392 = vmatpush3.bf16.msra.mxu1 %v423_v16 }
  0x41   :  { %373 = vmatprep.subr.bf16.mxu0 %v518_v0  ;;  %393 = vmatprep.subr.bf16.mxu1 %v518_v0 }
  0x44   :  { %374 = vmatpush3.bf16.msra.mxu0 %v416_v13  ;;  %394 = vmatpush3.bf16.msra.mxu1 %v424_v17 }
  0x47   :  { %376 = vmatmul.mubr.bf16.vlgmr.msra.gmra.mxu0 %v61_v15 }
 0x107   :  { %v167_v22 = vpop.f32.mrf.mxu0 }
 0x108   :  { %v168_v23 = vadd.f32 %v323_v21, %v167_v22 }
 0x109   :  { %v377_v24 = vpop.f32.mrf.mxu0 }
 0x10a   :  { %v192_v25 = vpack.c.bf16 %v168_v23, %v168_v23  ;;  %v180_v26 = vsel %vm179_vm3, %v168_v23, -inf }
 0x10b   :  { %v170_v27 = vpop.f32.mrf.mxu0  ;;  %181 = vmax.xlane.f32.xlu0 %v180_v26 }
 0x10c   :  { %396 = vmatmul.mubr.bf16.vlgmr.msra.gmra.mxu1 %v192_v25 }
 0x10d   :  { %v378_v28 = vpop.f32.mrf.mxu0 }
 0x194   :  { %v182_v29 = vpop.xlane.xlu0 %181 }
 0x195   :  { %v183_v30 = vrot.slane %v182_v29, 4 }
 0x197   :  { %v184_v31 = vmax.f32 %v182_v29, %v183_v30 }
 0x199   :  { %v185_v32 = vrot.slane %v184_v31, 2 }
 0x19b   :  { %v186_v33 = vmax.f32 %v184_v31, %v185_v32 }
 0x19d   :  { %v187_v34 = vrot.slane %v186_v33, 1 }
 0x19f   :  { %v188_v35 = vmax.f32 %v186_v33, %v187_v34 }
 0x1a1   :  { %399 = vpush %v188_v35 }
 0x1cc   :  { %v291_v36 = vpop.f32.mrf.mxu1 }
 0x1ce   :  { %v397_v37 = vpop.f32.mrf.mxu1 }
 0x1d0   :  { %v294_v38 = vpop.f32.mrf.mxu1 }
 0x1d2   :  { %s400_s2 = spop %399  ;;  %v398_v39 = vpop.f32.mrf.mxu1 }
 0x1d3   :  { %v190_v40 = vstv %s400_s2 }
 0x1d4   :  { %425 = vrcp.f32 %v190_v40 }
 0x1e1   :  { %v426_v41 = vpop.eup %425 }
 0x1e2   :  { %v297_v43 = vmul.f32 %v426_v41, %v291_v36 }
 0x1e4   :  { %v305_v44 = vadd.f32 %v340_v42, %v297_v43 }
 0x1e6   :  { %306 = vst [vmem:[#allocation8] sm:$0xff] %v305_v44 }
 0x1e7   :  { %498 = shalt.err (!%p495_p5)
}
 0x1e8   :  { %316 = dma.vmem_to_hbm [thread:$0]  %s314_s12, 128, %s574_s5, [#allocation4]  }
 0x1e9   :  { %511 = dma.done.wait [#allocation4], 128  }
 0x1ea   :  { %512 = vsyncadd [#allocation4], 4294967168 }
 0x1eb   :  { %320 = vsyncpa [#allocation3], 1 }
 0x1ec   :  { %321 = vsyncpa [#allocation6], 1 }
 0x1ed   :  { %322 = vsyncpa [#allocation4], 1 }

</bundles_post_ra>
